<compile_context>
chip_gen: v7x
topology: tpu7x:2x2x1
jax: 0.10.0
libtpu: 0.0.40
codegen_flags: <defaults>
</compile_context>

<pallas_src>
import functools

import jax
import jax.numpy as jnp
from jax.experimental import pallas as pl
from jax.experimental.pallas import tpu as pltpu


def _round_up(v, m):
    return (v + m - 1) // m * m


def _ffn_kernel(x_ref, w1_ref, b1_ref, w2_ref, b2_ref, g_ref, beta_ref,
                o_ref, acc_ref, *, eps, d_in, d_in_pad):
    k = pl.program_id(1)

    @pl.when(k == 0)
    def _init():
        acc_ref[...] = jnp.zeros_like(acc_ref)

    # Conv1d_1 (kernel=1): x @ W1^T, native-dtype operands on the MXU, f32 acc.
    h = jnp.dot(x_ref[...], w1_ref[...], preferred_element_type=jnp.float32)
    h = jnp.maximum(h + b1_ref[...].astype(jnp.float32), 0.0)          # ReLU

    # Conv1d_2 (kernel=1): accumulate the partial (tile_m, d_in) slab in f32.
    acc_ref[...] += jnp.dot(h.astype(w2_ref.dtype), w2_ref[...],
                            preferred_element_type=jnp.float32)

    @pl.when(k == pl.num_programs(1) - 1)
    def _epilogue():
        # Hoisted f32 locals (biases / affine params read once).
        x_f32 = x_ref[...].astype(jnp.float32)
        b2 = b2_ref[...].astype(jnp.float32)
        g = g_ref[...].astype(jnp.float32)
        b = beta_ref[...].astype(jnp.float32)

        # TODO(synk): dropout omitted (eval-mode identity); training-mode dropout
        # would use pltpu.prng_seed / pltpu.stateful_bernoulli.
        z = acc_ref[...] + b2 + x_f32          # bias-2 + residual (padded lanes stay 0)

        # LayerNorm over the true d_in (padded lanes are zero and masked out).
        mean = jnp.sum(z, axis=-1, keepdims=True) * (1.0 / d_in)
        zc = z - mean
        if d_in_pad != d_in:
            lane = jax.lax.broadcasted_iota(jnp.int32, zc.shape, 1)
            zc = jnp.where(lane < d_in, zc, 0.0)
        var = jnp.sum(zc * zc, axis=-1, keepdims=True) * (1.0 / d_in)
        inv = jax.lax.rsqrt(var + eps)
        o_ref[...] = (zc * inv * g + b).astype(o_ref.dtype)


def positionwise_feed_forward(x, w1, b1, w2, b2, gamma, beta,
                              *, eps=1e-5, tile_m=256, tile_k=512):
    """x: [B, S, d_in]; w1: [d_hid, d_in]; w2: [d_in, d_hid] (PyTorch Conv1d
    layout with the kernel=1 dim squeezed). Returns [B, S, d_in]."""
    B, S, d_in = x.shape
    d_hid = w1.shape[0]
    M = B * S

    # Padded / clamped tiling (lane-dense last dim, (8,128)-aligned blocks).
    d_in_p = _round_up(d_in, 128)
    tile_m = min(tile_m, _round_up(M, 8))
    tile_k = min(tile_k, _round_up(d_hid, 128))
    m_p = _round_up(M, tile_m)
    d_hid_p = _round_up(d_hid, tile_k)

    x2d = jnp.pad(x.reshape(M, d_in), ((0, m_p - M), (0, d_in_p - d_in)))
    w1t = jnp.pad(w1.T, ((0, d_in_p - d_in), (0, d_hid_p - d_hid)))   # (d_in_p, d_hid_p)
    w2t = jnp.pad(w2.T, ((0, d_hid_p - d_hid), (0, d_in_p - d_in)))   # (d_hid_p, d_in_p)
    b1r = jnp.pad(b1.reshape(1, d_hid), ((0, 0), (0, d_hid_p - d_hid)))
    b2r = jnp.pad(b2.reshape(1, d_in), ((0, 0), (0, d_in_p - d_in)))
    gr = jnp.pad(gamma.reshape(1, d_in), ((0, 0), (0, d_in_p - d_in)))
    br = jnp.pad(beta.reshape(1, d_in), ((0, 0), (0, d_in_p - d_in)))

    n_m = m_p // tile_m
    n_k = d_hid_p // tile_k

    # Explicit VMEM budget (double-buffered streamed tiles + f32 accumulator),
    # capped well under v7x's 64 MiB physical VMEM.
    x_bytes = jnp.dtype(x.dtype).itemsize
    w_bytes = jnp.dtype(w1.dtype).itemsize
    est = (2 * tile_m * d_in_p * x_bytes          # x tiles
           + 2 * tile_m * d_in_p * x_bytes        # out tiles
           + 2 * d_in_p * tile_k * w_bytes        # W1 tiles
           + 2 * tile_k * d_in_p * w_bytes        # W2 tiles
           + 2 * tile_k * w_bytes                 # b1 tiles
           + 6 * d_in_p * w_bytes                 # b2 / gamma / beta
           + tile_m * d_in_p * 4)                 # f32 accumulator scratch
    vmem_limit = int(min(60 * 2**20, max(32 * 2**20, 2 * est)))

    kernel = functools.partial(_ffn_kernel, eps=eps, d_in=d_in, d_in_pad=d_in_p)

    out2d = pl.pallas_call(
        kernel,
        out_shape=jax.ShapeDtypeStruct((m_p, d_in_p), x.dtype),
        grid_spec=pltpu.PrefetchScalarGridSpec(
            num_scalar_prefetch=0,
            grid=(n_m, n_k),
            in_specs=[
                pl.BlockSpec((tile_m, d_in_p), lambda i, k: (i, 0)),   # x rows
                pl.BlockSpec((d_in_p, tile_k), lambda i, k: (0, k)),   # W1^T tile
                pl.BlockSpec((1, tile_k), lambda i, k: (0, k)),        # b1 tile
                pl.BlockSpec((tile_k, d_in_p), lambda i, k: (k, 0)),   # W2^T tile
                pl.BlockSpec((1, d_in_p), lambda i, k: (0, 0)),        # b2
                pl.BlockSpec((1, d_in_p), lambda i, k: (0, 0)),        # gamma
                pl.BlockSpec((1, d_in_p), lambda i, k: (0, 0)),        # beta
            ],
            out_specs=pl.BlockSpec((tile_m, d_in_p), lambda i, k: (i, 0)),
            scratch_shapes=[pltpu.VMEM((tile_m, d_in_p), jnp.float32)],
        ),
        compiler_params=pltpu.CompilerParams(
            dimension_semantics=("parallel", "arbitrary"),
            vmem_limit_bytes=vmem_limit),
    )(x2d, w1t, b1r, w2t, b2r, gr, br)

    return out2d[:M, :d_in].reshape(B, S, d_in)


def _reference(x, w1, b1, w2, b2, gamma, beta, eps=1e-5):
    # Pure-JAX reference mirroring the PyTorch module in eval mode.
    hp = jax.lax.Precision.HIGHEST
    h = jax.nn.relu(jnp.einsum('bsd,hd->bsh', x, w1, precision=hp) + b1)
    y = jnp.einsum('bsh,dh->bsd', h, w2, precision=hp) + b2
    z = y + x
    mean = jnp.mean(z, axis=-1, keepdims=True)
    var = jnp.mean((z - mean) ** 2, axis=-1, keepdims=True)
    return (z - mean) / jnp.sqrt(var + eps) * gamma + beta


def _make_params(key, d_in, d_hid):
    k1, kb1, k2, kb2, kg, kb = jax.random.split(key, 6)
    w1 = jax.random.normal(k1, (d_hid, d_in), dtype=jnp.float32) * 0.1
    b1 = jax.random.normal(kb1, (d_hid,), dtype=jnp.float32) * 0.1
    w2 = jax.random.normal(k2, (d_in, d_hid), dtype=jnp.float32) * 0.1
    b2 = jax.random.normal(kb2, (d_in,), dtype=jnp.float32) * 0.1
    gamma = 1.0 + 0.1 * jax.random.normal(kg, (d_in,), dtype=jnp.float32)
    beta = 0.1 * jax.random.normal(kb, (d_in,), dtype=jnp.float32)
    return w1, b1, w2, b2, gamma, beta


if __name__ == "__main__":
    key = jax.random.PRNGKey(0)

    # Case 1: lane-aligned shapes, multi-step d_hid reduction (grid = (1, 2)).
    B, S, d_in, d_hid = 2, 16, 128, 512
    kx, kp = jax.random.split(key)
    x = jax.random.normal(kx, (B, S, d_in), dtype=jnp.float32)
    params = _make_params(kp, d_in, d_hid)
    out = positionwise_feed_forward(x, *params, tile_k=256)
    out = jax.block_until_ready(out)
    ref = _reference(x, *params)
    assert out.shape == (B, S, d_in)
    assert jnp.allclose(out, ref, atol=2e-3, rtol=2e-3), "case1 mismatch vs reference"

    # Case 2: ragged shapes (exercise M / d_in / d_hid padding + lane masking).
    B2, S2, d_in2, d_hid2 = 2, 7, 96, 80
    kx2, kp2 = jax.random.split(kp)
    x2 = jax.random.normal(kx2, (B2, S2, d_in2), dtype=jnp.float32)
    params2 = _make_params(kp2, d_in2, d_hid2)
    out2 = positionwise_feed_forward(x2, *params2)
    out2 = jax.block_until_ready(out2)
    ref2 = _reference(x2, *params2)
    assert out2.shape == (B2, S2, d_in2)
    assert jnp.allclose(out2, ref2, atol=2e-3, rtol=2e-3), "case2 mismatch vs reference"

    print("KERNEL_OK")
</pallas_src>

<mosaic_0001>
module attributes {stable_mosaic.version = 11 : i64} {
  func.func @_ffn_kernel(%arg0: i32, %arg1: i32, %arg2: memref<32x128xf32, #tpu.memory_space<vmem>>, %arg3: memref<128x256xf32, #tpu.memory_space<vmem>>, %arg4: memref<1x256xf32, #tpu.memory_space<vmem>>, %arg5: memref<256x128xf32, #tpu.memory_space<vmem>>, %arg6: memref<1x128xf32, #tpu.memory_space<vmem>>, %arg7: memref<1x128xf32, #tpu.memory_space<vmem>>, %arg8: memref<1x128xf32, #tpu.memory_space<vmem>>, %arg9: memref<32x128xf32, #tpu.memory_space<vmem>>, %arg10: memref<32x128xf32, #tpu.memory_space<vmem>>) attributes {dimension_semantics = [#tpu.dimension_semantics<parallel>, #tpu.dimension_semantics<arbitrary>], iteration_bounds = array<i64: 1, 2>, scalar_prefetch = 0 : i64, scratch_operands = 1 : i64, tpu.core_type = #tpu.core_type<tc>, window_params = [{transform_indices = @transform_0, window_bounds = array<i64: 32, 128>}, {transform_indices = @transform_1, window_bounds = array<i64: 128, 256>}, {transform_indices = @transform_2, window_bounds = array<i64: 1, 256>}, {transform_indices = @transform_3, window_bounds = array<i64: 256, 128>}, {pipeline_mode = #tpu.pipeline_mode<synchronous>, transform_indices = @transform_4, window_bounds = array<i64: 1, 128>}, {pipeline_mode = #tpu.pipeline_mode<synchronous>, transform_indices = @transform_5, window_bounds = array<i64: 1, 128>}, {pipeline_mode = #tpu.pipeline_mode<synchronous>, transform_indices = @transform_6, window_bounds = array<i64: 1, 128>}, {transform_indices = @transform_7, window_bounds = array<i64: 32, 128>}]} {
    %c0_i32 = arith.constant 0 : i32
    %0 = arith.cmpi eq, %arg1, %c0_i32 : i32
    %1 = arith.extui %0 : i1 to i32
    %c0_i32_0 = arith.constant 0 : i32
    %2 = arith.cmpi ne, %1, %c0_i32_0 : i32
    scf.if %2 {
      %cst_15 = arith.constant 0.000000e+00 : f32
      %19 = vector.broadcast %cst_15 : f32 to vector<32x128xf32>
      %c0_16 = arith.constant 0 : index
      %c0_17 = arith.constant 0 : index
      %20 = vector.load %arg10[%c0_16, %c0_17] : memref<32x128xf32, #tpu.memory_space<vmem>>, vector<32x128xf32>
      tpu.vector_store %arg10[%c0_16, %c0_17], %19 {strides = array<i32>} : memref<32x128xf32, #tpu.memory_space<vmem>>, vector<32x128xf32>,
    } else {
    }
    %c0 = arith.constant 0 : index
    %c0_1 = arith.constant 0 : index
    %3 = vector.load %arg2[%c0, %c0_1] : memref<32x128xf32, #tpu.memory_space<vmem>>, vector<32x128xf32>
    %c0_2 = arith.constant 0 : index
    %c0_3 = arith.constant 0 : index
    %4 = vector.load %arg3[%c0_2, %c0_3] : memref<128x256xf32, #tpu.memory_space<vmem>>, vector<128x256xf32>
    %cst = arith.constant dense<0.000000e+00> : vector<32x256xf32>
    %5 = tpu.matmul %3, %4, %cst {dimension_numbers = #tpu.dot_dimension_numbers<[1], [0], [0], [1], [0, 0, 1, 1], [], []>} : vector<32x128xf32>, vector<128x256xf32>, vector<32x256xf32> -> vector<32x256xf32>
    %c0_4 = arith.constant 0 : index
    %c0_5 = arith.constant 0 : index
    %6 = vector.load %arg4[%c0_4, %c0_5] : memref<1x256xf32, #tpu.memory_space<vmem>>, vector<1x256xf32>
    %7 = vector.broadcast %6 : vector<1x256xf32> to vector<32x256xf32>
    %8 = arith.addf %5, %7 : vector<32x256xf32>
    %cst_6 = arith.constant 0.000000e+00 : f32
    %9 = vector.broadcast %cst_6 : f32 to vector<32x256xf32>
    %10 = arith.maximumf %8, %9 : vector<32x256xf32>
    %c0_7 = arith.constant 0 : index
    %c0_8 = arith.constant 0 : index
    %11 = vector.load %arg10[%c0_7, %c0_8] : memref<32x128xf32, #tpu.memory_space<vmem>>, vector<32x128xf32>
    %c0_9 = arith.constant 0 : index
    %c0_10 = arith.constant 0 : index
    %12 = vector.load %arg5[%c0_9, %c0_10] : memref<256x128xf32, #tpu.memory_space<vmem>>, vector<256x128xf32>
    %cst_11 = arith.constant dense<0.000000e+00> : vector<32x128xf32>
    %13 = tpu.matmul %10, %12, %cst_11 {dimension_numbers = #tpu.dot_dimension_numbers<[1], [0], [0], [1], [0, 0, 1, 1], [], []>} : vector<32x256xf32>, vector<256x128xf32>, vector<32x128xf32> -> vector<32x128xf32>
    %14 = arith.addf %11, %13 : vector<32x128xf32>
    %c0_12 = arith.constant 0 : index
    %c0_13 = arith.constant 0 : index
    %15 = vector.load %arg10[%c0_12, %c0_13] : memref<32x128xf32, #tpu.memory_space<vmem>>, vector<32x128xf32>
    tpu.vector_store %arg10[%c0_12, %c0_13], %14 {strides = array<i32>} : memref<32x128xf32, #tpu.memory_space<vmem>>, vector<32x128xf32>,
    %c1_i32 = arith.constant 1 : i32
    %16 = arith.cmpi eq, %arg1, %c1_i32 : i32
    %17 = arith.extui %16 : i1 to i32
    %c0_i32_14 = arith.constant 0 : i32
    %18 = arith.cmpi ne, %17, %c0_i32_14 : i32
    scf.if %18 {
      %c0_15 = arith.constant 0 : index
      %c0_16 = arith.constant 0 : index
      %19 = vector.load %arg2[%c0_15, %c0_16] : memref<32x128xf32, #tpu.memory_space<vmem>>, vector<32x128xf32>
      %c0_17 = arith.constant 0 : index
      %c0_18 = arith.constant 0 : index
      %20 = vector.load %arg6[%c0_17, %c0_18] : memref<1x128xf32, #tpu.memory_space<vmem>>, vector<1x128xf32>
      %c0_19 = arith.constant 0 : index
      %c0_20 = arith.constant 0 : index
      %21 = vector.load %arg7[%c0_19, %c0_20] : memref<1x128xf32, #tpu.memory_space<vmem>>, vector<1x128xf32>
      %c0_21 = arith.constant 0 : index
      %c0_22 = arith.constant 0 : index
      %22 = vector.load %arg8[%c0_21, %c0_22] : memref<1x128xf32, #tpu.memory_space<vmem>>, vector<1x128xf32>
      %c0_23 = arith.constant 0 : index
      %c0_24 = arith.constant 0 : index
      %23 = vector.load %arg10[%c0_23, %c0_24] : memref<32x128xf32, #tpu.memory_space<vmem>>, vector<32x128xf32>
      %24 = vector.broadcast %20 : vector<1x128xf32> to vector<32x128xf32>
      %25 = arith.addf %23, %24 : vector<32x128xf32>
      %26 = arith.addf %25, %19 : vector<32x128xf32>
      %cst_25 = arith.constant dense<0.000000e+00> : vector<32xf32>
      %27 = vector.multi_reduction <add>, %26, %cst_25 [1] : vector<32x128xf32> to vector<32xf32>
      %28 = vector.shape_cast %27 : vector<32xf32> to vector<32x1xf32>
      %cst_26 = arith.constant 7.812500e-03 : f32
      %29 = vector.broadcast %cst_26 : f32 to vector<32x1xf32>
      %30 = arith.mulf %28, %29 : vector<32x1xf32>
      %31 = vector.broadcast %30 : vector<32x1xf32> to vector<32x128xf32>
      %32 = arith.subf %26, %31 : vector<32x128xf32>
      %33 = arith.mulf %32, %32 : vector<32x128xf32>
      %cst_27 = arith.constant dense<0.000000e+00> : vector<32xf32>
      %34 = vector.multi_reduction <add>, %33, %cst_27 [1] : vector<32x128xf32> to vector<32xf32>
      %35 = vector.shape_cast %34 : vector<32xf32> to vector<32x1xf32>
      %cst_28 = arith.constant 7.812500e-03 : f32
      %36 = vector.broadcast %cst_28 : f32 to vector<32x1xf32>
      %37 = arith.mulf %35, %36 : vector<32x1xf32>
      %cst_29 = arith.constant 9.99999974E-6 : f32
      %38 = vector.broadcast %cst_29 : f32 to vector<32x1xf32>
      %39 = arith.addf %37, %38 : vector<32x1xf32>
      %40 = math.rsqrt %39 : vector<32x1xf32>
      %41 = vector.broadcast %40 : vector<32x1xf32> to vector<32x128xf32>
      %42 = arith.mulf %32, %41 : vector<32x128xf32>
      %43 = vector.broadcast %21 : vector<1x128xf32> to vector<32x128xf32>
      %44 = arith.mulf %42, %43 : vector<32x128xf32>
      %45 = vector.broadcast %22 : vector<1x128xf32> to vector<32x128xf32>
      %46 = arith.addf %44, %45 : vector<32x128xf32>
      %c0_30 = arith.constant 0 : index
      %c0_31 = arith.constant 0 : index
      %47 = vector.load %arg9[%c0_30, %c0_31] : memref<32x128xf32, #tpu.memory_space<vmem>>, vector<32x128xf32>
      tpu.vector_store %arg9[%c0_30, %c0_31], %46 {strides = array<i32>} : memref<32x128xf32, #tpu.memory_space<vmem>>, vector<32x128xf32>,
    } else {
    }
    return
  }
  func.func @transform_0(%arg0: i32, %arg1: i32) -> (i32, i32) {
    %c0_i32 = arith.constant 0 : i32
    %c0_i32_0 = arith.constant 0 : i32
    return %arg0, %c0_i32 : i32, i32
  }
  func.func @transform_1(%arg0: i32, %arg1: i32) -> (i32, i32) {
    %c0_i32 = arith.constant 0 : i32
    %c0_i32_0 = arith.constant 0 : i32
    return %c0_i32, %arg1 : i32, i32
  }
  func.func @transform_2(%arg0: i32, %arg1: i32) -> (i32, i32) {
    %c0_i32 = arith.constant 0 : i32
    %c0_i32_0 = arith.constant 0 : i32
    return %c0_i32, %arg1 : i32, i32
  }
  func.func @transform_3(%arg0: i32, %arg1: i32) -> (i32, i32) {
    %c0_i32 = arith.constant 0 : i32
    %c0_i32_0 = arith.constant 0 : i32
    return %arg1, %c0_i32 : i32, i32
  }
  func.func @transform_4(%arg0: i32, %arg1: i32) -> (i32, i32) {
    %c0_i32 = arith.constant 0 : i32
    %c0_i32_0 = arith.constant 0 : i32
    %c0_i32_1 = arith.constant 0 : i32
    return %c0_i32, %c0_i32_0 : i32, i32
  }
  func.func @transform_5(%arg0: i32, %arg1: i32) -> (i32, i32) {
    %c0_i32 = arith.constant 0 : i32
    %c0_i32_0 = arith.constant 0 : i32
    %c0_i32_1 = arith.constant 0 : i32
    return %c0_i32, %c0_i32_0 : i32, i32
  }
  func.func @transform_6(%arg0: i32, %arg1: i32) -> (i32, i32) {
    %c0_i32 = arith.constant 0 : i32
    %c0_i32_0 = arith.constant 0 : i32
    %c0_i32_1 = arith.constant 0 : i32
    return %c0_i32, %c0_i32_0 : i32, i32
  }
  func.func @transform_7(%arg0: i32, %arg1: i32) -> (i32, i32) {
    %c0_i32 = arith.constant 0 : i32
    %c0_i32_0 = arith.constant 0 : i32
    return %arg0, %c0_i32 : i32, i32
  }
}

</mosaic_0001>

<bundles_post_ra>
// kernel: tpu_custom_call.1
= control target key start
LH: loop header
LB: loop body
LE: loop exit
PB: predicated region body
PF: predicated region fallthrough
CT: control target
= control target key end

     0   :  { %s1660_s0 = inlined_call_operand.hbm [shape: f32[32,128], index: 0, kind: input, shape index: {}]   ;;  %s1661_s1 = inlined_call_operand.hbm [shape: f32[128,512], index: 1, kind: input, shape index: {}]   ;;  %s1662_s2 = inlined_call_operand.vmem [shape: f32[1,512], index: 2, kind: input, shape index: {}]   ;;  %s1663_s3 = inlined_call_operand.hbm [shape: f32[512,128], index: 3, kind: input, shape index: {}]   ;;  %s1664_s4 = inlined_call_operand.vmem [shape: f32[1,128], index: 4, kind: input, shape index: {}]   ;;  %s1665_s5 = inlined_call_operand.vmem [shape: f32[1,128], index: 5, kind: input, shape index: {}]   ;;  %s1666_s6 = inlined_call_operand.vmem [shape: f32[1,128], index: 6, kind: input, shape index: {}]   ;;  %s1667_s7 = inlined_call_operand.hbm [shape: f32[32,128], index: 7, kind: output, shape index: {}]  }
   0x1   :  { %1676 = sst [smem:[#allocation15_spill]] %s1661_s1 }
   0x2   :  { %12 = vsyncpa [#allocation4], 0 }
   0x3   :  { %13 = vsyncpa [#allocation7], 0 }
   0x4   :  { %15 = vsyncpa [#allocation7 + $0x1], 0 }
   0x5   :  { %16 = vsyncpa [#allocation5], 0  ;;  %s1336_s24 = smov 0   ;;  %s1338_s25 = smov 0  }
   0x6   :  { %s1340_s26 = smov 0   ;;  %s1342_s27 = smov 0  }
   0x7   :  { %s1344_s28 = smov 0   ;;  %s1346_s29 = smov 0  }
   0x8 LB: > { %1677 = sst [smem:[#allocation13_spill]] %s1277_s28  ;;  %s31_s30 = sadd.s32 1, %s1277_s28  ;;  %s1281_s29 = sphi %s1346_s29, %s22_s29   ;;  %s1277_s28 = sphi %s1344_s28, %s1692_s28   ;;  %s1273_s27 = sphi %s1342_s27, %s1691_s27   ;;  %s1269_s26 = sphi %s1340_s26, %s1695_s26   ;;  %s1265_s25 = sphi %s1338_s25, %s1694_s25   ;;  %s1261_s24 = sphi %s1336_s24, %s1693_s24  }
   0x9   : > { %s67_s8 = sadd.s32 1, %s1269_s26  ;;  %p32_p0 = scmp.ge.s32.totalorder %s31_s30, 2 }
   0xa   : > { %p74_p1 = scmp.ne.s32.totalorder %s1269_s26, %s1265_s25  ;;  %p75_p2 = scmp.eq.s32.totalorder %s1281_s29, 0 }
   0xb   : > { %s1697_s30 = smov (%p32_p0, %s31_s30), 0  ;;  %p1038_p4 = scmp.lt.s32.totalorder %s1281_s29, 2 }
   0xc   : > { %1678 = sst [smem:[#allocation14_spill]] %s1697_s30  ;;  %p76_p3 = por %p75_p2, %p74_p1 }
   0xd   : > { %s64_s9 = ssub.s32 %s1277_s28, %s1697_s30  ;;  %s270_s10 = sand.u32 1, %s1281_s29  }
   0xe   : > { %p65_p5 = scmp.eq.s32.totalorder %s64_s9, 0  ;;  %s272_s11 = sand.u32 1, %s1269_s26  }
   0xf   : > { %s904_s12 = sshll.u32 %s1277_s28, 8  ;;  %s1382_s14 = sshll.u32 %s272_s11, 8 }
  0x10   : > { %s1380_s13 = scalar_select %p65_p5, %s1269_s26, %s67_s8  }
  0x11   : > { %s1679_s1 = sld [smem:[#allocation15_spill]]  ;;  %p1389_p6 = pnand %p1038_p4, %p76_p3 }
  0x12   : > { %s274_s19 = scalar_lea.vmem [#allocation6], %s1382_s14  ;;  %s1396_s21 = scalar_lea.sflag [#allocation7], %s270_s10 }
  0x13   : > { %s1680_s18 = scalar_select %p1389_p6, 1, 0 }
  0x14   : > { %s281_s20 = sshll.u32 %s274_s19, 4  ;;  %p1671_p8 = pneg %p1389_p6  ;;  %s1394_s20 = int_to_ptr.vmem [resolvable:$true] %s281_s20 }
  0x17   : > { %s1387_s17 = scalar_lea.hbm %s1679_s1, %s904_s12  ;;  %s1114_s9 = scalar_lea.hbm %s1679_s1, 8192 }
  0x18   : > { %s1109_s22 = scalar_lea.hbm %s1387_s17, 4096  ;;  %p1115_p11 = scmp.lt.u32.totalorder %s1387_s17, %s1679_s1 }
  0x19   : > { %p1110_p7 = scmp.ne.s32.totalorder %s1387_s17, %s1109_s22  ;;  %p1116_p12 = scmp.lt.u32.totalorder %s1114_s9, %s1109_s22 }
  0x1a   : > { %p1118_p0 = scmp.lt.u32.totalorder %s1109_s22, %s1387_s17 }
  0x1b   : > { %p1112_p9 = pnand %p1671_p8, %p1110_p7  ;;  %p1117_p13 = por %p1116_p12, %p1115_p11 }
  0x1d   : > { %p1113_p10 = pneg %p1112_p9  ;;  %p1119_p1 = por %p1118_p0, %p1117_p13 }
  0x1f   : > { %p1120_p2 = pnand %p1119_p1, %p1113_p10 }
  0x21   : > { %1123 = shalt.err (!%p1120_p2)
}
  0x22   : > { %s1124_s10 = scalar_lea.vmem %s1394_s20, 4096  ;;  %s1283_s15 = smov [#allocation6]  }
  0x23   : > { %p1125_p3 = scmp.ne.s32.totalorder %s1394_s20, %s1124_s10  ;;  %s1129_s16 = sshll.u32 %s1283_s15, 4  ;;  %s1130_s16 = int_to_ptr.vmem [resolvable:$false] %s1129_s16 }
  0x24   : > { %s1131_s19 = scalar_lea.vmem %s1130_s16, 8192  ;;  %p1132_p7 = scmp.lt.s32.totalorder %s1394_s20, %s1130_s16 }
  0x25   : > { %p1127_p4 = pnand %p1125_p3, %p1671_p8  ;;  %p1133_p9 = scmp.lt.s32.totalorder %s1131_s19, %s1124_s10 }
  0x27   : > { %p1128_p5 = pneg %p1127_p4  ;;  %p1134_p11 = por %p1133_p9, %p1132_p7 }
  0x29   : > { %p1135_p12 = pnand %p1134_p11, %p1128_p5 }
  0x2b   : > { %1138 = shalt.err (!%p1135_p12)
}
  0x2c   : > { %s1284_s22 = smov 512   ;;  %s1285_s23 = smov 256  }
  0x2d   : > { %s1286_s8 = smov 16   ;;  %s1425_s9 = sadd.s32 4294967295, %s1281_s29  }
  0x2e   : > { %1033 = dma.hbm_to_vmem [thread:$0]  (!%p1389_p6), %s1387_s17, 4096, %s1394_s20, %s1396_s21, %s1284_s22, %s1285_s23, %s1286_s8  }
  0x2f   : > { %p80_p10 = scmp.ne.s32.totalorder %s1265_s25, %s1261_s24  ;;  %p1670_p13 = scmp.eq.s32.totalorder %s1425_s9, 0 }
  0x30   : > { %p881_p0 = scmp.ge.s32.totalorder %s1281_s29, 1  ;;  %p232_p1 = scmp.lt.s32.totalorder %s1281_s29, 3 }
  0x31   : > { %p1434_p2 = por %p1670_p13, %p80_p10  ;;  %s1287_s17 = smov [#allocation3]  }
  0x32   : > { %p1438_p3 = pnand %p881_p0, %p232_p1  ;;  %s247_s20 = sshll.u32 %s1287_s17, 4  ;;  %s1442_s20 = int_to_ptr.vmem [resolvable:$true] %s247_s20 }
  0x33   : > { %s1681_s11 = scalar_select %p1434_p2, 1, 0 }
  0x34   : > { %s1682_s12 = scalar_select %p1438_p3, 1, 0 }
  0x35   : > { %p1026_p4 = pneg %p1438_p3  ;;  %s905_s24 = sshll.u32 %s1277_s28, 12 }
  0x36   : > { %s1456_s19 = scalar_lea.hbm %s1663_s3, %s905_s24  ;;  %s303_s22 = scalar_lea.vmem [#allocation8], %s1382_s14 }
  0x37   : > { %p1449_p5 = pnand %p1026_p4, %p1670_p13  ;;  %s310_s23 = sshll.u32 %s303_s22, 4  ;;  %s1459_s23 = int_to_ptr.vmem [resolvable:$true] %s310_s23 }
  0x38   : > { %s1139_s1 = scalar_lea.hbm %s1660_s0, 512 }
  0x39   : > { %p1140_p7 = scmp.ne.s32.totalorder %s1660_s0, %s1139_s1  ;;  %p1141_p9 = pneg %p1449_p5 }
  0x3a   : > { %p1146_p10 = scmp.lt.u32.totalorder %s1139_s1, %s1660_s0 }
  0x3b   : > { %p1142_p11 = pnand %p1141_p9, %p1140_p7 }
  0x3d   : > { %p1143_p12 = pneg %p1142_p11 }
  0x3f   : > { %p1148_p0 = pnand %p1146_p10, %p1143_p12 }
  0x41   : > { %1151 = shalt.err (!%p1148_p0)
}
  0x42   : > { %s1152_s14 = scalar_lea.vmem %s1442_s20, 512  ;;  %p1160_p8 = scmp.lt.s32.totalorder %s1442_s20, %s1442_s20 }
  0x43   : > { %p1153_p1 = scmp.ne.s32.totalorder %s1442_s20, %s1152_s14  ;;  %p1161_p2 = scmp.lt.s32.totalorder %s1152_s14, %s1152_s14 }
  0x45   : > { %p1155_p4 = pnand %p1153_p1, %p1141_p9  ;;  %p1162_p3 = por %p1161_p2, %p1160_p8 }
  0x47   : > { %p1156_p13 = pneg %p1155_p4 }
  0x49   : > { %p1163_p6 = pnand %p1162_p3, %p1156_p13 }
  0x4b   : > { %1166 = shalt.err (!%p1163_p6)
}
  0x4c   : > { %s1288_s28 = smov 128   ;;  %s1289_s1 = smov 8  }
  0x4d   : > { %1029 = dma.hbm_to_vmem [thread:$0]  (!%p1449_p5), %s1660_s0, 512, %s1442_s20, [#allocation4], %s1288_s28, %s1288_s28, %s1289_s1  }
  0x4e   : > { %s1167_s22 = scalar_lea.hbm %s1456_s19, 4096  ;;  %p1684_p6 = scmp.ne.s32.totalorder %s1680_s18, 0 }
  0x4f   : > { %p1168_p8 = scmp.ne.s32.totalorder %s1456_s19, %s1167_s22  ;;  %s1172_s15 = scalar_lea.hbm %s1663_s3, 8192 }
  0x50   : > { %p1685_p13 = pneg %p1684_p6  ;;  %p1173_p7 = scmp.lt.u32.totalorder %s1456_s19, %s1663_s3 }
  0x51   : > { %p1174_p9 = scmp.lt.u32.totalorder %s1172_s15, %s1167_s22  ;;  %p1176_p12 = scmp.lt.u32.totalorder %s1167_s22, %s1456_s19 }
  0x52   : > { %p1170_p2 = pnand %p1168_p8, %p1685_p13 }
  0x53   : > { %p1175_p11 = por %p1174_p9, %p1173_p7 }
  0x54   : > { %p1171_p3 = pneg %p1170_p2 }
  0x55   : > { %p1177_p10 = por %p1176_p12, %p1175_p11 }
  0x57   : > { %p1178_p0 = pnand %p1177_p10, %p1171_p3 }
  0x59   : > { %1181 = shalt.err (!%p1178_p0)
}
  0x5a   : > { %s1182_s20 = scalar_lea.vmem %s1459_s23, 4096  ;;  %p1686_p1 = pmov %p1685_p13 }
  0x5b   : > { %p1183_p5 = scmp.ne.s32.totalorder %s1459_s23, %s1182_s20  ;;  %s1290_s10 = smov [#allocation8]  }
  0x5c   : > { %s1187_s30 = sshll.u32 %s1290_s10, 4  ;;  %s1188_s30 = int_to_ptr.vmem [resolvable:$false] %s1187_s30 }
  0x5d   : > { %p1185_p4 = pnand %p1183_p5, %p1686_p1  ;;  %s1189_s24 = scalar_lea.vmem %s1188_s30, 8192 }
  0x5e   : > { %p1190_p13 = scmp.lt.s32.totalorder %s1459_s23, %s1188_s30  ;;  %p1191_p2 = scmp.lt.s32.totalorder %s1189_s24, %s1182_s20 }
  0x5f   : > { %p1186_p8 = pneg %p1185_p4 }
  0x60   : > { %p1192_p7 = por %p1191_p2, %p1190_p13 }
  0x62   : > { %p1193_p9 = pnand %p1192_p7, %p1186_p8 }
  0x64   : > { %1196 = shalt.err (!%p1193_p9)
}
  0x65   : > { %1036 = dma.hbm_to_vmem [thread:$0]  (!%p1684_p6), %s1456_s19, 4096, %s1459_s23, %s1396_s21, %s1288_s28, %s1288_s28, %s1289_s1  }
  0x66   : > { %p1687_p3 = scmp.ne.s32.totalorder %s1682_s12, 0 }
  0x67   : > { %p1688_p11 = scmp.eq.s32.totalorder (!%p1687_p3), %s1425_s9, 0 }
  0x68   : > { %322 = sbr.rel (%p1687_p3) target bundleno = 959 (0x3bf), region = 48 }
  0x6f   : > { %1248 = dma.done.wait (%p1688_p11), [#allocation4], 512   ;;  %p1689_p12 = pmov %p1688_p11 }
  0x70   : > { %s328_s18 = sand.u32 1, %s1425_s9   ;;  %s330_s22 = sand.u32 1, %s1265_s25  }
  0x71   : > { %1250 = vsyncadd (%p1689_p12), [#allocation4], 4294966784  ;;  %s892_s8 = sshll.u32 %s330_s22, 8  ;;  %s329_s17 = scalar_lea.sflag [#allocation7], %s328_s18 }
  0x72   : > { %s1520_s15 = scalar_lea.vmem [#allocation6], %s892_s8  ;;  %p1690_p10 = scmp.ne.s32.totalorder %s1681_s11, 0 }
  0x74   : > { %1252 = dma.done.wait (%p1690_p10), %s329_s17, 8192  }
  0x75   : > { %1254 = vsyncadd (%p1690_p10), %s329_s17, 4294959104  ;;  %s894_s21 = sshll.u32 %s1273_s27, 1  ;;  %s1533_s28 = scalar_lea.vmem [#allocation8], %s892_s8 }
  0x76   : > { %p379_p6 = scmp.lt.s32.totalorder %s894_s21, 3  ;;  %p895_p0 = scmp.ne.s32.totalorder %s1273_s27, 0 }
  0x77   : > { %v1291_v0 = vmov (!%p895_p0), 0.0  }
  0x78   : > { %s1699_s21 = smov (!%p379_p6, %s894_s21), 3  ;;  %388 = sbr.rel (%p895_p0) target bundleno = 127 (0x7f), region = 64 }
  0x79   : > { %s381_s23 = scalar_lea.vmem %s1662_s2, %s1699_s21  ;;  %389 = vst [vmem:[#allocation2] sm:$0xff] (!%p895_p0), %v1291_v0  ;;  %390 = vst [vmem:[#allocation2 + $0x8] sm:$0xff] (!%p895_p0), %v1291_v0 }
  0x7a   : > { %391 = vst [vmem:[#allocation2 + $0x10] sm:$0xff] (!%p895_p0), %v1291_v0  ;;  %392 = vst [vmem:[#allocation2 + $0x18] sm:$0xff] (!%p895_p0), %v1291_v0 }
  0x7f PF: > { %v398_v1 = vld [vmem:[%s1520_s15 + $0x8] sm:$0xff]  ;;  %v400_v2 = vld [vmem:[%s1520_s15 + $0x18] sm:$0xff]  ;;  %v397_v3 = vld [vmem:[%s1520_s15] sm:$0xff]  ;;  %v1292_v8 = vmov 0.0   ;;  %p896_p5 = scmp.ne.s32.totalorder %s1273_s27, 1 }
  0x80   : > { %v950_v4 = vpack.c.bf16 %v400_v2, %v398_v1  ;;  %v399_v5 = vld [vmem:[%s1520_s15 + $0x10] sm:$0xff]  ;;  %v402_v6 = vld [vmem:[%s1520_s15 + $0x28] sm:$0xff]  ;;  %v404_v7 = vld [vmem:[%s1520_s15 + $0x38] sm:$0xff]  ;;  %505 = vmatprep.mubr.f32.mxu0 %v1292_v8 }
  0x81   : > { %v952_v9 = vpack.c.bf16 %v399_v5, %v397_v3  ;;  %v954_v10 = vpack.c.bf16 %v404_v7, %v402_v6  ;;  %v401_v11 = vld [vmem:[%s1520_s15 + $0x20] sm:$0xff]  ;;  %v403_v12 = vld [vmem:[%s1520_s15 + $0x30] sm:$0xff]  ;;  %v406_v13 = vld [vmem:[%s1520_s15 + $0x48] sm:$0xff] }
  0x82   : > { %951 = vmatprep.subr.bf16.mxu0 %v950_v4  ;;  %v408_v14 = vld [vmem:[%s1520_s15 + $0x58] sm:$0xff]  ;;  %v956_v15 = vpack.c.bf16 %v403_v12, %v401_v11  ;;  %v405_v17 = vld [vmem:[%s1520_s15 + $0x40] sm:$0xff]  ;;  %v407_v18 = vld [vmem:[%s1520_s15 + $0x50] sm:$0xff] }
  0x83   : > { %953 = vmatpush1.bf16.msra.mxu0 %v952_v9  ;;  %v958_v16 = vpack.c.bf16 %v408_v14, %v406_v13  ;;  %v410_v19 = vld [vmem:[%s1520_s15 + $0x68] sm:$0xff]  ;;  %v412_v20 = vld [vmem:[%s1520_s15 + $0x78] sm:$0xff]  ;;  %v960_v21 = vpack.c.bf16 %v407_v18, %v405_v17  ;;  %v409_v23 = vld [vmem:[%s1520_s15 + $0x60] sm:$0xff] }
  0x84   : > { %955 = vmatprep.subr.bf16.mxu0 %v954_v10  ;;  %v962_v22 = vpack.c.bf16 %v412_v20, %v410_v19  ;;  %v411_v24 = vld [vmem:[%s1520_s15 + $0x70] sm:$0xff]  ;;  %v414_v25 = vld [vmem:[%s1520_s15 + $0x88] sm:$0xff]  ;;  %v416_v26 = vld [vmem:[%s1520_s15 + $0x98] sm:$0xff] }
  0x85   : > { %v413_v27 = vld [vmem:[%s1520_s15 + $0x80] sm:$0xff]  ;;  %v415_v28 = vld [vmem:[%s1520_s15 + $0x90] sm:$0xff]  ;;  %v964_v29 = vpack.c.bf16 %v411_v24, %v409_v23  ;;  %v418_v30 = vld [vmem:[%s1520_s15 + $0xa8] sm:$0xff]  ;;  %v966_v35 = vpack.c.bf16 %v416_v26, %v414_v25 }
  0x86   : > { %v420_v31 = vld [vmem:[%s1520_s15 + $0xb8] sm:$0xff]  ;;  %v558_v32 = vld [vmem:[%s1533_s28 + $0x80] sm:$0xff]  ;;  %v559_v33 = vld [vmem:[%s1533_s28 + $0x88] sm:$0xff]  ;;  %v968_v46 = vpack.c.bf16 %v415_v28, %v413_v27 }
  0x87   : > { %957 = vmatpush1.bf16.msra.mxu0 %v956_v15  ;;  %v542_v34 = vld [vmem:[%s1533_s28] sm:$0xff]  ;;  %v982_v36 = vpack.c.bf16 %v559_v33, %v558_v32  ;;  %v543_v37 = vld [vmem:[%s1533_s28 + $0x8] sm:$0xff]  ;;  %v560_v38 = vld [vmem:[%s1533_s28 + $0x90] sm:$0xff]  ;;  %v970_v50 = vpack.c.bf16 %v420_v31, %v418_v30 }
  0x88   : > { %959 = vmatprep.subr.bf16.mxu0 %v958_v16  ;;  %v561_v39 = vld [vmem:[%s1533_s28 + $0x98] sm:$0xff]  ;;  %v984_v40 = vpack.c.bf16 %v543_v37, %v542_v34  ;;  %v544_v42 = vld [vmem:[%s1533_s28 + $0x10] sm:$0xff]  ;;  %v562_v44 = vld [vmem:[%s1533_s28 + $0xa0] sm:$0xff] }
  0x89   : > { %v986_v41 = vpack.c.bf16 %v561_v39, %v560_v38  ;;  %v545_v43 = vld [vmem:[%s1533_s28 + $0x18] sm:$0xff]  ;;  %983 = vmatprep.subr.bf16.mxu1 %v982_v36  ;;  %v563_v45 = vld [vmem:[%s1533_s28 + $0xa8] sm:$0xff]  ;;  %v417_v47 = vld [vmem:[%s1520_s15 + $0xa0] sm:$0xff]  ;;  %v431_v39 = vlaneseq }
  0x8a   : > { %v419_v48 = vld [vmem:[%s1520_s15 + $0xb0] sm:$0xff]  ;;  %985 = vmatpush3.bf16.msra.mxu1 %v984_v40  ;;  %v988_v49 = vpack.c.bf16 %v545_v43, %v544_v42  ;;  %v422_v51 = vld [vmem:[%s1520_s15 + $0xc8] sm:$0xff]  ;;  %v990_v52 = vpack.c.bf16 %v563_v45, %v562_v44  ;;  %v546_v53 = vld [vmem:[%s1533_s28 + $0x20] sm:$0xff] }
  0x8b   : > { %961 = vmatpush1.bf16.msra.mxu0 %v960_v21  ;;  %987 = vmatprep.subr.bf16.mxu1 %v986_v41  ;;  %v547_v54 = vld [vmem:[%s1533_s28 + $0x28] sm:$0xff]  ;;  %v424_v55 = vld [vmem:[%s1520_s15 + $0xd8] sm:$0xff]  ;;  %v564_v56 = vld [vmem:[%s1533_s28 + $0xb0] sm:$0xff]  ;;  %v972_v58 = vpack.c.bf16 %v419_v48, %v417_v47  ;;  %v432_v40 = vshrl.u32 %v431_v39, 7 }
  0x8c   : > { %963 = vmatprep.subr.bf16.mxu0 %v962_v22  ;;  %v565_v57 = vld [vmem:[%s1533_s28 + $0xb8] sm:$0xff]  ;;  %v421_v59 = vld [vmem:[%s1520_s15 + $0xc0] sm:$0xff]  ;;  %v423_v60 = vld [vmem:[%s1520_s15 + $0xd0] sm:$0xff]  ;;  %v992_v61 = vpack.c.bf16 %v547_v54, %v546_v53  ;;  %v974_v62 = vpack.c.bf16 %v424_v55, %v422_v51 }
  0x8d   : > { %v426_v63 = vld [vmem:[%s1520_s15 + $0xe8] sm:$0xff]  ;;  %v994_v0 = vpack.c.bf16 %v565_v57, %v564_v56  ;;  %v548_v1 = vld [vmem:[%s1533_s28 + $0x30] sm:$0xff]  ;;  %v549_v2 = vld [vmem:[%s1533_s28 + $0x38] sm:$0xff]  ;;  %v976_v6 = vpack.c.bf16 %v423_v60, %v421_v59  ;;  %v433_v41 = vsub.s32 0, %v432_v40  ;;  %v437_v42 = vsub.s32 1, %v432_v40 }
  0x8e   : > { %989 = vmatpush3.bf16.msra.mxu1 %v988_v49  ;;  %v428_v3 = vld [vmem:[%s1520_s15 + $0xf8] sm:$0xff]  ;;  %v566_v4 = vld [vmem:[%s1533_s28 + $0xc0] sm:$0xff]  ;;  %v567_v5 = vld [vmem:[%s1533_s28 + $0xc8] sm:$0xff]  ;;  %v996_v9 = vpack.c.bf16 %v549_v2, %v548_v1 }
  0x8f   : > { %965 = vmatpush1.bf16.msra.mxu0 %v964_v29  ;;  %991 = vmatprep.subr.bf16.mxu1 %v990_v52  ;;  %v425_v7 = vld [vmem:[%s1520_s15 + $0xe0] sm:$0xff]  ;;  %v978_v10 = vpack.c.bf16 %v428_v3, %v426_v63  ;;  %v427_v11 = vld [vmem:[%s1520_s15 + $0xf0] sm:$0xff]  ;;  %v998_v12 = vpack.c.bf16 %v567_v5, %v566_v4  ;;  %v551_v14 = vld [vmem:[%s1533_s28 + $0x48] sm:$0xff] }
  0x90   : > { %967 = vmatprep.subr.bf16.mxu0 %v966_v35  ;;  %v550_v13 = vld [vmem:[%s1533_s28 + $0x40] sm:$0xff]  ;;  %v568_v15 = vld [vmem:[%s1533_s28 + $0xd0] sm:$0xff]  ;;  %v569_v16 = vld [vmem:[%s1533_s28 + $0xd8] sm:$0xff]  ;;  %v980_v17 = vpack.c.bf16 %v427_v11, %v425_v7 }
  0x91   : > { %v1000_v18 = vpack.c.bf16 %v551_v14, %v550_v13  ;;  %v1002_v19 = vpack.c.bf16 %v569_v16, %v568_v15  ;;  %v552_v20 = vld [vmem:[%s1533_s28 + $0x50] sm:$0xff]  ;;  %v553_v21 = vld [vmem:[%s1533_s28 + $0x58] sm:$0xff]  ;;  %v570_v22 = vld [vmem:[%s1533_s28 + $0xe0] sm:$0xff] }
  0x92   : > { %993 = vmatpush3.bf16.msra.mxu1 %v992_v61  ;;  %v571_v23 = vld [vmem:[%s1533_s28 + $0xe8] sm:$0xff]  ;;  %v393_v24 = vld [vmem:[#allocation3] sm:$0xff]  ;;  %v1004_v25 = vpack.c.bf16 %v553_v21, %v552_v20  ;;  %v395_v28 = vld [vmem:[#allocation3 + $0x10] sm:$0xff] }
  0x93   : > { %969 = vmatpush1.bf16.msra.mxu0 %v968_v46  ;;  %995 = vmatprep.subr.bf16.mxu1 %v994_v0  ;;  %v1006_v26 = vpack.c.bf16 %v571_v23, %v570_v22  ;;  %v394_v27 = vld [vmem:[#allocation3 + $0x8] sm:$0xff]  ;;  %v396_v29 = vld [vmem:[#allocation3 + $0x18] sm:$0xff]  ;;  %v554_v30 = vld [vmem:[%s1533_s28 + $0x60] sm:$0xff] }
  0x94   : > { %971 = vmatprep.subr.bf16.mxu0 %v970_v50  ;;  %v555_v31 = vld [vmem:[%s1533_s28 + $0x68] sm:$0xff]  ;;  %v572_v33 = vld [vmem:[%s1533_s28 + $0xf0] sm:$0xff]  ;;  %v573_v34 = vld [vmem:[%s1533_s28 + $0xf8] sm:$0xff] }
  0x95   : > { %v1008_v32 = vpack.c.bf16 %v555_v31, %v554_v30  ;;  %v1010_v35 = vpack.c.bf16 %v573_v34, %v572_v33  ;;  %v556_v36 = vld [vmem:[%s1533_s28 + $0x70] sm:$0xff]  ;;  %v557_v37 = vld [vmem:[%s1533_s28 + $0x78] sm:$0xff]  ;;  %v672_v33 = vld [vmem:[#allocation3 + $0x8] sm:$0xff] (!%p896_p5) }
  0x96   : > { %997 = vmatpush3.bf16.msra.mxu1 %v996_v9  ;;  %v1012_v38 = vpack.c.bf16 %v557_v37, %v556_v36  ;;  %v541_v22 = vld [vmem:[#allocation2 + $0x18] sm:$0xff]  ;;  %v673_v30 = vld [vmem:[#allocation3 + $0x10] sm:$0xff] (!%p896_p5) }
  0x97   : > { %973 = vmatpush1.bf16.msra.mxu0 %v972_v58  ;;  %999 = vmatprep.subr.bf16.mxu1 %v998_v12  ;;  %v539_v12 = vld [vmem:[#allocation2 + $0x8] sm:$0xff] }
  0x98   : > { %975 = vmatprep.subr.bf16.mxu0 %v974_v62 }
  0x9a   : > { %1001 = vmatpush3.bf16.msra.mxu1 %v1000_v18 }
  0x9b   : > { %977 = vmatpush1.bf16.msra.mxu0 %v976_v6  ;;  %1003 = vmatprep.subr.bf16.mxu1 %v1002_v19  ;;  %v538_v6 = vld [vmem:[#allocation2] sm:$0xff] }
  0x9c   : > { %979 = vmatprep.subr.bf16.mxu0 %v978_v10 }
  0x9e   : > { %1005 = vmatpush3.bf16.msra.mxu1 %v1004_v25 }
  0x9f   : > { %981 = vmatpush1.bf16.msra.mxu0 %v980_v17  ;;  %1007 = vmatprep.subr.bf16.mxu1 %v1006_v26  ;;  %v540_v17 = vld [vmem:[#allocation2 + $0x10] sm:$0xff]  ;;  %v671_v26 = vld [vmem:[#allocation3] sm:$0xff] (!%p896_p5) }
  0xa2   : > { %506 = vmatmul.mubr.f32.vlgmr.msra.gmra.mrb[0].mxu0 %v393_v24  ;;  %1009 = vmatpush3.bf16.msra.mxu1 %v1008_v32 }
  0xa3   : > { %511 = vmatprep.mubr.f32.mxu0 %v1292_v8  ;;  %1011 = vmatprep.subr.bf16.mxu1 %v1010_v35 }
  0xa6   : > { %512 = vmatmul.mubr.f32.gmra.mrb[2].mxu0 %v394_v27  ;;  %1013 = vmatpush3.bf16.msra.mxu1 %v1012_v38  ;;  %v897_v27 = vld [vmem:[%s1664_s4] ss:$0 sm:$0xff] (!%p896_p5)  ;;  %v674_v38 = vld [vmem:[#allocation3 + $0x18] sm:$0xff] (!%p896_p5) }
  0xa7   : > { %517 = vmatprep.mubr.f32.mxu0 %v1292_v8 }
  0xaa   : > { %518 = vmatmul.mubr.f32.gmra.mrb[4].mxu0 %v395_v28 }
  0xab   : > { %523 = vmatprep.mubr.f32.mxu0 %v1292_v8  ;;  %v429_v8 = vld [vmem:[%s381_s23] sm:$0x3] }
  0xac   : > { %v434_v43 = vrot.slane %v429_v8, %v433_v41  ;;  %v438_v44 = vrot.slane %v429_v8, %v437_v42 }
  0xae   : > { %524 = vmatmul.mubr.f32.gmra.mrb[6].mxu0 %v396_v29 }
 0x175   : > { %v507_v45 = vpop.f32.mrb[0].mxu0 }
 0x176   : > { %v508_v46 = vadd.f32 %v507_v45, %v434_v43  ;;  %v509_v47 = vpop.f32.mrb[1].mxu0 }
 0x177   : > { %v510_v48 = vadd.f32 %v509_v47, %v438_v44 }
 0x178   : > { %v530_v51 = vmax.f32 %v508_v46, 0.0 }
 0x179   : > { %v513_v49 = vpop.f32.mrb[2].mxu0  ;;  %v531_v50 = vmax.f32 %v510_v48, 0.0 }
 0x17a   : > { %v514_v52 = vadd.f32 %v513_v49, %v434_v43  ;;  %v515_v53 = vpop.f32.mrb[3].mxu0 }
 0x17b   : > { %v516_v54 = vadd.f32 %v515_v53, %v438_v44  ;;  %638 = vmatprep.mubr.f32.mxu1 %v531_v50 }
 0x17c   : > { %639 = vmatmul.mubr.f32.vlgmr.msra.gmra.mrb[0].mxu1 %v530_v51  ;;  %v532_v57 = vmax.f32 %v514_v52, 0.0 }
 0x17d   : > { %v533_v55 = vmax.f32 %v516_v54, 0.0  ;;  %v519_v56 = vpop.f32.mrb[4].mxu0 }
 0x17e   : > { %v520_v58 = vadd.f32 %v519_v56, %v434_v43  ;;  %v521_v59 = vpop.f32.mrb[5].mxu0 }
 0x17f   : > { %v522_v60 = vadd.f32 %v521_v59, %v438_v44  ;;  %643 = vmatprep.mubr.f32.mxu1 %v533_v55 }
 0x180   : > { %644 = vmatmul.mubr.f32.gmra.mrb[2].mxu1 %v532_v57  ;;  %v534_v63 = vmax.f32 %v520_v58, 0.0 }
 0x181   : > { %v535_v61 = vmax.f32 %v522_v60, 0.0  ;;  %v525_v62 = vpop.f32.mrb[6].mxu0 }
 0x182   : > { %v526_v0 = vadd.f32 %v525_v62, %v434_v43  ;;  %v527_v1 = vpop.f32.mrb[7].mxu0 }
 0x183   : > { %v528_v2 = vadd.f32 %v527_v1, %v438_v44  ;;  %648 = vmatprep.mubr.f32.mxu1 %v535_v61 }
 0x184   : > { %649 = vmatmul.mubr.f32.gmra.mrb[4].mxu1 %v534_v63  ;;  %v536_v4 = vmax.f32 %v526_v0, 0.0 }
 0x185   : > { %v537_v3 = vmax.f32 %v528_v2, 0.0 }
 0x187   : > { %653 = vmatprep.mubr.f32.mxu1 %v537_v3 }
 0x188   : > { %654 = vmatmul.mubr.f32.gmra.mrb[6].mxu1 %v536_v4 }
 0x24f   : > { %v938_v5 = vpop.f32.mrb[0].mxu1 }
 0x250   : > { %v939_v7 = vpop.f32.mrb[1].mxu1 }
 0x251   : > { %v940_v9 = vadd.f32 %v939_v7, %v938_v5  ;;  %v898_v7 = vld [vmem:[%s1665_s5] ss:$0 sm:$0xff] (!%p896_p5) }
 0x253   : > { %v659_v10 = vadd.f32 %v940_v9, %v538_v6  ;;  %v941_v11 = vpop.f32.mrb[2].mxu1 }
 0x254   : > { %v942_v13 = vpop.f32.mrb[3].mxu1 }
 0x255   : > { %663 = vst [vmem:[#allocation2] sm:$0xff] %v659_v10  ;;  %v943_v14 = vadd.f32 %v942_v13, %v941_v11  ;;  %v899_v10 = vld [vmem:[%s1666_s6] ss:$0 sm:$0xff] (!%p896_p5) }
 0x257   : > { %v660_v15 = vadd.f32 %v943_v14, %v539_v12  ;;  %v944_v16 = vpop.f32.mrb[4].mxu1 }
 0x258   : > { %v945_v18 = vpop.f32.mrb[5].mxu1 }
 0x259   : > { %664 = vst [vmem:[#allocation2 + $0x8] sm:$0xff] %v660_v15  ;;  %v946_v19 = vadd.f32 %v945_v18, %v944_v16 }
 0x25b   : > { %v661_v20 = vadd.f32 %v946_v19, %v540_v17  ;;  %v947_v21 = vpop.f32.mrb[6].mxu1  ;;  %670 = sbr.rel (%p896_p5) target bundleno = 933 (0x3a5), region = 68 }
 0x25c   : > { %v948_v23 = vpop.f32.mrb[7].mxu1  ;;  %v678_v28 = vld [vmem:[#allocation2] sm:$0xff] (!%p896_p5) }
 0x25d   : > { %665 = vst [vmem:[#allocation2 + $0x10] sm:$0xff] %v661_v20  ;;  %v949_v24 = vadd.f32 %v948_v23, %v947_v21  ;;  %v688_v29 = vadd.f32 (!%p896_p5), %v897_v27, %v678_v28 }
 0x25f   : > { %v662_v25 = vadd.f32 %v949_v24, %v541_v22  ;;  %v692_v36 = vadd.f32 (!%p896_p5), %v688_v29, %v671_v26 }
 0x260   : > { %v679_v34 = vld [vmem:[#allocation2 + $0x8] sm:$0xff] (!%p896_p5) }
 0x261   : > { %666 = vst [vmem:[#allocation2 + $0x18] sm:$0xff] %v662_v25  ;;  %v689_v37 = vadd.f32 (!%p896_p5), %v897_v27, %v679_v34  ;;  %696 = vadd.xlane.f32.xlu0 (!%p896_p5), %v692_v36 }
 0x263   : > { %v693_v41 = vadd.f32 %v689_v37, %v672_v33 }
 0x264   : > { %v680_v31 = vld [vmem:[#allocation2 + $0x10] sm:$0xff] }
 0x265   : > { %v690_v32 = vadd.f32 %v897_v27, %v680_v31  ;;  %698 = vadd.xlane.f32.xlu0 %v693_v41 }
 0x267   : > { %v694_v40 = vadd.f32 %v690_v32, %v673_v30 }
 0x268   : > { %v681_v35 = vld [vmem:[#allocation2 + $0x18] sm:$0xff] }
 0x269   : > { %v691_v39 = vadd.f32 %v897_v27, %v681_v35  ;;  %700 = vadd.xlane.f32.xlu1 %v694_v40 }
 0x26b   : > { %v695_v8 = vadd.f32 %v691_v39, %v674_v38 }
 0x26d   : > { %702 = vadd.xlane.f32.xlu1 %v695_v8 }
 0x2ee   : > { %v697_v42 = vpop.xlane.xlu0 %696 }
 0x2ef   : > { %v704_v43 = vmul.f32 0.0078125, %v697_v42 }
 0x2f1   : > { %v708_v46 = vsub.f32 %v692_v36, %v704_v43 }
 0x2f2   : > { %v699_v48 = vpop.xlane.xlu0 %698 }
 0x2f3   : > { %v705_v49 = vmul.f32 0.0078125, %v699_v48  ;;  %v712_v50 = vmul.f32 %v708_v46, %v708_v46 }
 0x2f5   : > { %v709_v53 = vsub.f32 %v693_v41, %v705_v49  ;;  %716 = vadd.xlane.f32.xlu0 %v712_v50 }
 0x2f6   : > { %v701_v44 = vpop.xlane.xlu1 %700 }
 0x2f7   : > { %v706_v45 = vmul.f32 0.0078125, %v701_v44  ;;  %v713_v56 = vmul.f32 %v709_v53, %v709_v53 }
 0x2f9   : > { %v710_v47 = vsub.f32 %v694_v40, %v706_v45  ;;  %718 = vadd.xlane.f32.xlu1 %v713_v56 }
 0x2fa   : > { %v703_v51 = vpop.xlane.xlu1 %702 }
 0x2fb   : > { %v707_v52 = vmul.f32 0.0078125, %v703_v51  ;;  %v714_v54 = vmul.f32 %v710_v47, %v710_v47 }
 0x2fd   : > { %v711_v55 = vsub.f32 %v695_v8, %v707_v52  ;;  %720 = vadd.xlane.f32.xlu0 %v714_v54 }
 0x2ff   : > { %v715_v57 = vmul.f32 %v711_v55, %v711_v55 }
 0x301   : > { %722 = vadd.xlane.f32.xlu1 %v715_v57 }
 0x382   : > { %v717_v58 = vpop.xlane.xlu0 %716 }
 0x383   : > { %v724_v59 = vmul.f32 0.0078125, %v717_v58 }
 0x385   : > { %v728_v60 = vadd.f32 1e-05, %v724_v59 }
 0x386   : > { %v719_v61 = vpop.xlane.xlu1 %718 }
 0x387   : > { %1101 = vrsqrt.f32 %v728_v60  ;;  %v725_v63 = vmul.f32 0.0078125, %v719_v61 }
 0x389   : > { %v729_v1 = vadd.f32 1e-05, %v725_v63 }
 0x38a   : > { %v721_v62 = vpop.xlane.xlu0 %720 }
 0x38b   : > { %v726_v0 = vmul.f32 0.0078125, %v721_v62  ;;  %1103 = vrsqrt.f32 %v729_v1 }
 0x38d   : > { %v730_v2 = vadd.f32 1e-05, %v726_v0 }
 0x38e   : > { %v723_v3 = vpop.xlane.xlu1 %722 }
 0x38f   : > { %v727_v4 = vmul.f32 0.0078125, %v723_v3  ;;  %1105 = vrsqrt.f32 %v730_v2 }
 0x391   : > { %v731_v5 = vadd.f32 1e-05, %v727_v4  ;;  %v1102_v6 = vpop.eup %1101 }
 0x392   : > { %v736_v9 = vmul.f32 %v1102_v6, %v708_v46 }
 0x393   : > { %1107 = vrsqrt.f32 %v731_v5 }
 0x394   : > { %v746_v11 = vmul.f32 %v898_v7, %v736_v9 }
 0x395   : > { %v1104_v12 = vpop.eup %1103 }
 0x396   : > { %v756_v14 = vadd.f32 %v899_v10, %v746_v11  ;;  %v737_v15 = vmul.f32 %v1104_v12, %v709_v53 }
 0x398   : > { %760 = vst [vmem:[#allocation9] sm:$0xff] %v756_v14  ;;  %v747_v17 = vmul.f32 %v898_v7, %v737_v15 }
 0x399   : > { %v1106_v13 = vpop.eup %1105 }
 0x39a   : > { %v738_v16 = vmul.f32 %v1106_v13, %v710_v47  ;;  %v757_v20 = vadd.f32 %v899_v10, %v747_v17 }
 0x39c   : > { %v748_v19 = vmul.f32 %v898_v7, %v738_v16  ;;  %761 = vst [vmem:[#allocation9 + $0x8] sm:$0xff] %v757_v20 }
 0x39d   : > { %v1108_v18 = vpop.eup %1107 }
 0x39e   : > { %v739_v21 = vmul.f32 %v1108_v18, %v711_v55  ;;  %v758_v22 = vadd.f32 %v899_v10, %v748_v19 }
 0x3a0   : > { %v749_v23 = vmul.f32 %v898_v7, %v739_v21  ;;  %762 = vst [vmem:[#allocation9 + $0x10] sm:$0xff] %v758_v22 }
 0x3a2   : > { %v759_v24 = vadd.f32 %v899_v10, %v749_v23 }
 0x3a4   : > { %763 = vst [vmem:[#allocation9 + $0x18] sm:$0xff] %v759_v24 }
 0x3a5 PF: > { %p1040_p1 = scmp.eq.s32.totalorder %s1425_s9, 1  ;;  %s1293_s24 = smov [#allocation9]  }
 0x3a6   : > { %s773_s18 = sshll.u32 %s1293_s24, 4  ;;  %s774_s18 = int_to_ptr.vmem [resolvable:$true] %s773_s18 }
 0x3a7   : > { %s1197_s22 = scalar_lea.vmem %s774_s18, 512  ;;  %p1204_p2 = scmp.lt.s32.totalorder %s774_s18, %s774_s18 }
 0x3a8   : > { %p1198_p4 = scmp.ne.s32.totalorder %s774_s18, %s1197_s22  ;;  %p1205_p7 = scmp.lt.s32.totalorder %s1197_s22, %s1197_s22 }
 0x3aa   : > { %p1199_p8 = pnand %p1198_p4, %p1040_p1  ;;  %p1206_p9 = por %p1205_p7, %p1204_p2 }
 0x3ac   : > { %p1200_p13 = pneg %p1199_p8 }
 0x3ae   : > { %p1207_p3 = pnand %p1206_p9, %p1200_p13 }
 0x3b0   : > { %1210 = shalt.err (!%p1207_p3)
}
 0x3b1   : > { %s1211_s15 = scalar_lea.hbm %s1667_s7, 512 }
 0x3b2   : > { %p1212_p11 = scmp.ne.s32.totalorder %s1667_s7, %s1211_s15  ;;  %p1217_p6 = scmp.lt.u32.totalorder %s1211_s15, %s1667_s7 }
 0x3b4   : > { %p1213_p12 = pnand %p1212_p11, %p1040_p1 }
 0x3b6   : > { %p1214_p10 = pneg %p1213_p12 }
 0x3b8   : > { %p1219_p0 = pnand %p1217_p6, %p1214_p10 }
 0x3ba   : > { %1222 = shalt.err (!%p1219_p0)
}
 0x3bb   : > { %s1294_s28 = smov 128   ;;  %s1295_s11 = smov 8  }
 0x3bc   : > { %1023 = dma.vmem_to_hbm [thread:$0]  (%p1040_p1), %s774_s18, 512, %s1667_s7, [#allocation5], %s1294_s28, %s1294_s28, %s1295_s11  }
 0x3bd   : > { %1256 = dma.done.wait (%p1040_p1), [#allocation5], 512  }
 0x3be   : > { %1258 = vsyncadd (%p1040_p1), [#allocation5], 4294966784 }
 0x3bf PF: > { %s22_s29 = sadd.s32 1, %s1281_s29   ;;  %s1691_s27 = sld [smem:[#allocation13_spill]] }
 0x3c0   : > { %p19_p5 = scmp.ge.s32.totalorder %s22_s29, 4   ;;  %s1692_s28 = sld [smem:[#allocation14_spill]] }
 0x3c1   : > { %s1693_s24 = smov %s1265_s25  ;;  %s1694_s25 = smov %s1269_s26 }
 0x3c2   : > { %s1695_s26 = smov %s1380_s13  ;;  %21 = sbr.rel (!%p19_p5) target bundleno = 8 (0x8), region = 114 }
 0x3c9   :  { %789 = vsyncpa [#allocation4], 1 }
 0x3ca   :  { %791 = vsyncpa [#allocation4 + $0x1], 1 }
 0x3cb   :  { %792 = vsyncpa [#allocation7], 1 }
 0x3cc   :  { %794 = vsyncpa [#allocation7 + $0x1], 1 }
 0x3cd   :  { %795 = vsyncpa [#allocation5], 1 }
 0x3ce   :  { %797 = vsyncpa [#allocation5 + $0x1], 1 }

</bundles_post_ra>
